<compile_context>
chip_gen: v7x
topology: tpu7x:2x2x1
jax: 0.10.0
libtpu: 0.0.40
codegen_flags: <defaults>
</compile_context>

<pallas_src>
import functools

import numpy as np
import jax
import jax.numpy as jnp
from jax.experimental import pallas as pl
from jax.experimental.pallas import tpu as pltpu


# ---------------------------------------------------------------------------
# Fused kernel: two-stage residual VQ + per-tile code-usage histograms.
#   For a token tile x (TM, D), codebooks cb (K, D), (-2*cb)^T (D, K),
#   hoisted |cb|^2 (1, K):
#     d       = |cb|^2 + x @ (-2 cb)^T       (|x|^2 row constant dropped)
#     idx     = first argmin_k d             (matches torch.min tie-breaking)
#     x_d     = onehot(idx) @ cb             (embedding via MXU)
#     counts  = valid_mask(1,TM) @ onehot    (histogram via MXU, ragged-safe)
# ---------------------------------------------------------------------------
def _rvq_fused_kernel(m_total,
                      x_ref, cb1_ref, cb2_ref, cb1dT_ref, cb2dT_ref,
                      cb1sq_ref, cb2sq_ref,
                      xd1_ref, xd2_ref, xd_ref, counts_ref):
    i = pl.program_id(0)

    x = x_ref[...]                      # (TM, D) f32
    tm = x.shape[0]
    k = cb1_ref.shape[0]

    col_iota = jax.lax.broadcasted_iota(jnp.int32, (tm, k), 1)

    def nearest(v, cb_ref, cbdT_ref, cbsq_ref):
        # d = |cb|^2 - 2 v.cb ; per-row |v|^2 constant omitted (argmin- and
        # tie-break-invariant since distances are never output).
        d = cbsq_ref[...] + jnp.dot(v, cbdT_ref[...],
                                    preferred_element_type=jnp.float32)
        d_min = jnp.min(d, axis=-1, keepdims=True)
        # first index achieving the minimum (matches torch.min tie-breaking)
        idx = jnp.min(jnp.where(d == d_min, col_iota, k), axis=-1, keepdims=True)
        onehot = (col_iota == idx).astype(jnp.float32)          # (TM, K)
        emb = jnp.dot(onehot, cb_ref[...], preferred_element_type=jnp.float32)
        return onehot, emb

    oh1, xd1 = nearest(x, cb1_ref, cb1dT_ref, cb1sq_ref)
    oh2, xd2 = nearest(x - xd1, cb2_ref, cb2dT_ref, cb2sq_ref)

    xd1_ref[...] = xd1
    xd2_ref[...] = xd2
    xd_ref[...] = xd1 + xd2            # eval-mode STE value (== x + sg(xd-x))

    # Valid-row mask (lane-dense (1, TM)); histogram as an MXU matmul so the
    # masking + sublane reduction never touch the VPU/XLU.  OOB xd writes on
    # the ragged last tile are discarded automatically by Pallas.
    if m_total % tm != 0:
        row = jax.lax.broadcasted_iota(jnp.int32, (1, tm), 1) + i * tm
        valid = (row < m_total).astype(jnp.float32)             # (1, TM)
    else:
        valid = jnp.ones((1, tm), dtype=jnp.float32)

    c1 = jnp.dot(valid, oh1, preferred_element_type=jnp.float32)   # (1, K)
    c2 = jnp.dot(valid, oh2, preferred_element_type=jnp.float32)   # (1, K)
    counts_ref[...] = jnp.concatenate([c1, c2], axis=0)             # (2, K)


def residual_quantize(x_flat, codebook1, codebook2, *, tm=2048):
    """x_flat: (M, D) f32.

    Returns xd1, xd2, xd_sum (each (M, D) f32) and counts (2, K) f32
    code-usage histograms.
    """
    m, d = x_flat.shape
    k, _ = codebook1.shape

    # Large token tile to amortize per-grid-step overhead; clamp for small M
    # and keep the sublane dim a multiple of 8.
    tm = max(8, min(tm, ((m + 7) // 8) * 8))
    n_blocks = pl.cdiv(m, tm)

    # Hoisted once in the wrapper: |cb|^2 (1, K) and the pre-scaled,
    # pre-transposed distance codebooks (-2*cb)^T (D, K).
    cb1_sq = jnp.sum(codebook1 * codebook1, axis=-1)[None, :]   # (1, K)
    cb2_sq = jnp.sum(codebook2 * codebook2, axis=-1)[None, :]   # (1, K)
    cb1d_t = (-2.0 * codebook1).T                               # (D, K)
    cb2d_t = (-2.0 * codebook2).T                               # (D, K)

    xd1, xd2, xd, counts_blocks = pl.pallas_call(
        functools.partial(_rvq_fused_kernel, m),
        out_shape=(
            jax.ShapeDtypeStruct((m, d), jnp.float32),
            jax.ShapeDtypeStruct((m, d), jnp.float32),
            jax.ShapeDtypeStruct((m, d), jnp.float32),
            jax.ShapeDtypeStruct((n_blocks, 2, k), jnp.float32),
        ),
        grid_spec=pltpu.PrefetchScalarGridSpec(
            num_scalar_prefetch=0,
            grid=(n_blocks,),
            in_specs=[
                pl.BlockSpec((tm, d), lambda i: (i, 0)),
                pl.BlockSpec((k, d), lambda i: (0, 0)),
                pl.BlockSpec((k, d), lambda i: (0, 0)),
                pl.BlockSpec((d, k), lambda i: (0, 0)),
                pl.BlockSpec((d, k), lambda i: (0, 0)),
                pl.BlockSpec((1, k), lambda i: (0, 0)),
                pl.BlockSpec((1, k), lambda i: (0, 0)),
            ],
            out_specs=[
                pl.BlockSpec((tm, d), lambda i: (i, 0)),
                pl.BlockSpec((tm, d), lambda i: (i, 0)),
                pl.BlockSpec((tm, d), lambda i: (i, 0)),
                # one tiny (2, K) histogram slab per grid step -> no resident
                # accumulator, so the grid axis can be fully parallel.
                pl.BlockSpec((None, 2, k), lambda i: (i, 0, 0)),
            ],
        ),
        compiler_params=pltpu.CompilerParams(
            # Every output block is unique per grid step, so the axis is
            # safe to shard across v7x's two TensorCores.
            dimension_semantics=("parallel",),
            vmem_limit_bytes=32 * 1024 * 1024,
        ),
    )(x_flat, codebook1, codebook2, cb1d_t, cb2d_t, cb1_sq, cb2_sq)

    counts = jnp.sum(counts_blocks, axis=0)          # (2, K), tiny XLA reduce
    return xd1, xd2, xd, counts


def _perplexity_from_counts(counts):
    """counts: (2, K) f32 -> (2,) f32 perplexities (tiny, plain JAX)."""
    prob = counts / jnp.sum(counts, axis=-1, keepdims=True)
    return jnp.exp(-jnp.sum(prob * jnp.log(prob + 1e-7), axis=-1))


# ---------------------------------------------------------------------------
# Forward wrapper (eval-mode ResQuantize.forward)
# ---------------------------------------------------------------------------
def res_quantize_forward(x, codebook1, codebook2, lambda_code2=1.0):
    """x: (N, width, T) f32; codebooks: (nb_code, code_dim), code_dim == width."""
    n, width, t = x.shape
    nb_code, code_dim = codebook1.shape
    assert code_dim == width

    # preprocess: (N, width, T) -> (N, T, width) -> (N*T, width).
    x_flat = jnp.transpose(x, (0, 2, 1)).reshape(n * t, width)

    x_d1, x_d2, x_d_flat, counts = residual_quantize(x_flat, codebook1, codebook2)

    ppl = _perplexity_from_counts(counts)
    perplexity1, perplexity2 = ppl[0], ppl[1]

    commit_x = x_flat
    commit_x_d1 = jax.lax.stop_gradient(x_d1)
    commit_x_d2 = jax.lax.stop_gradient(x_d2)

    # Straight-through estimator: the forward value of
    # x + stop_grad(x_d1 + x_d2 - x) is exactly x_d1 + x_d2, which the kernel
    # already emitted (this is an eval/forward implementation; the STE
    # gradient wiring is not reconstructed here).
    x_d = jnp.transpose(x_d_flat.reshape(n, t, width), (0, 2, 1))  # (N, width, T)

    return x_d, (commit_x, commit_x_d1, commit_x_d2), (perplexity1, perplexity2)


# ---------------------------------------------------------------------------
# Pure-JAX reference (eval-mode semantics) for validation.
# ---------------------------------------------------------------------------
def _reference_forward(x, cb1, cb2):
    n, width, t = x.shape
    xf = jnp.transpose(x, (0, 2, 1)).reshape(n * t, width)

    def nearest(v, cb):
        d = jnp.sum((v[:, None, :] - cb[None, :, :]) ** 2, axis=-1)
        idx = jnp.argmin(d, axis=-1)
        return idx, cb[idx]

    def ppl(idx, k):
        counts = jnp.sum(jax.nn.one_hot(idx, k, dtype=jnp.float32), axis=0)
        p = counts / jnp.sum(counts)
        return jnp.exp(-jnp.sum(p * jnp.log(p + 1e-7)))

    i1, xd1 = nearest(xf, cb1)
    xr = xf - xd1
    i2, xd2 = nearest(xr, cb2)
    x_d = jnp.transpose((xd1 + xd2).reshape(n, t, width), (0, 2, 1))
    return x_d, xd1, xd2, ppl(i1, cb1.shape[0]), ppl(i2, cb2.shape[0])


if __name__ == "__main__":
    # Module hyper-parameters (small, synthetic)
    nb_code = 64
    code_dim = 32
    mu = 0.99  # only used by training-time EMA updates; unused in eval forward
    # TODO(synk): training-time codebook EMA updates / init_codebook are host-side
    # state mutation and are not implemented here (eval-mode forward only).

    n, t = 2, 8   # batch, sequence length -> M = 16 tokens

    key = jax.random.PRNGKey(0)
    k_x, k_cb1, k_cb2 = jax.random.split(key, 3)

    x = jax.random.normal(k_x, (n, code_dim, t), dtype=jnp.float32)
    codebook1 = jax.random.normal(k_cb1, (nb_code, code_dim), dtype=jnp.float32)
    codebook2 = 0.1 * jax.random.normal(k_cb2, (nb_code, code_dim), dtype=jnp.float32)

    x_d, (cx, cxd1, cxd2), (ppl1, ppl2) = res_quantize_forward(x, codebook1, codebook2)
    jax.block_until_ready((x_d, cx, cxd1, cxd2, ppl1, ppl2))

    assert x_d.shape == (n, code_dim, t)
    assert cx.shape == (n * t, code_dim)
    assert cxd1.shape == (n * t, code_dim)
    assert cxd2.shape == (n * t, code_dim)

    # Validate against the pure-JAX reference.
    r_xd, r_xd1, r_xd2, r_p1, r_p2 = _reference_forward(x, codebook1, codebook2)
    np.testing.assert_allclose(np.asarray(x_d), np.asarray(r_xd), rtol=1e-5, atol=1e-5)
    np.testing.assert_allclose(np.asarray(cxd1), np.asarray(r_xd1), rtol=1e-5, atol=1e-5)
    np.testing.assert_allclose(np.asarray(cxd2), np.asarray(r_xd2), rtol=1e-5, atol=1e-5)
    np.testing.assert_allclose(np.asarray(ppl1), np.asarray(r_p1), rtol=1e-5, atol=1e-5)
    np.testing.assert_allclose(np.asarray(ppl2), np.asarray(r_p2), rtol=1e-5, atol=1e-5)
    np.testing.assert_allclose(np.asarray(cx),
                               np.asarray(jnp.transpose(x, (0, 2, 1)).reshape(n * t, code_dim)),
                               rtol=0, atol=0)

    print("KERNEL_OK")
</pallas_src>

<mosaic_0001>
module attributes {stable_mosaic.version = 11 : i64} {
  func.func @_rvq_fused_kernel(%arg0: i32, %arg1: memref<16x32xf32, #tpu.memory_space<vmem>>, %arg2: memref<64x32xf32, #tpu.memory_space<vmem>>, %arg3: memref<64x32xf32, #tpu.memory_space<vmem>>, %arg4: memref<32x64xf32, #tpu.memory_space<vmem>>, %arg5: memref<32x64xf32, #tpu.memory_space<vmem>>, %arg6: memref<1x64xf32, #tpu.memory_space<vmem>>, %arg7: memref<1x64xf32, #tpu.memory_space<vmem>>, %arg8: memref<16x32xf32, #tpu.memory_space<vmem>>, %arg9: memref<16x32xf32, #tpu.memory_space<vmem>>, %arg10: memref<16x32xf32, #tpu.memory_space<vmem>>, %arg11: memref<1x2x64xf32, #tpu.memory_space<vmem>>) attributes {dimension_semantics = [#tpu.dimension_semantics<parallel>], iteration_bounds = array<i64: 1>, scalar_prefetch = 0 : i64, scratch_operands = 0 : i64, tpu.core_type = #tpu.core_type<tc>, window_params = [{transform_indices = @transform_0, window_bounds = array<i64: 16, 32>}, {pipeline_mode = #tpu.pipeline_mode<synchronous>, transform_indices = @transform_1, window_bounds = array<i64: 64, 32>}, {pipeline_mode = #tpu.pipeline_mode<synchronous>, transform_indices = @transform_2, window_bounds = array<i64: 64, 32>}, {pipeline_mode = #tpu.pipeline_mode<synchronous>, transform_indices = @transform_3, window_bounds = array<i64: 32, 64>}, {pipeline_mode = #tpu.pipeline_mode<synchronous>, transform_indices = @transform_4, window_bounds = array<i64: 32, 64>}, {pipeline_mode = #tpu.pipeline_mode<synchronous>, transform_indices = @transform_5, window_bounds = array<i64: 1, 64>}, {pipeline_mode = #tpu.pipeline_mode<synchronous>, transform_indices = @transform_6, window_bounds = array<i64: 1, 64>}, {transform_indices = @transform_7, window_bounds = array<i64: 16, 32>}, {transform_indices = @transform_8, window_bounds = array<i64: 16, 32>}, {transform_indices = @transform_9, window_bounds = array<i64: 16, 32>}, {transform_indices = @transform_10, window_bounds = array<i64: 1, 2, 64>}]} {
    %c0 = arith.constant 0 : index
    %c0_0 = arith.constant 0 : index
    %0 = vector.load %arg1[%c0, %c0_0] : memref<16x32xf32, #tpu.memory_space<vmem>>, vector<16x32xf32>
    %1 = tpu.iota {dimensions = array<i32: 1>} : vector<16x64xi32>
    %c0_1 = arith.constant 0 : index
    %c0_2 = arith.constant 0 : index
    %2 = vector.load %arg6[%c0_1, %c0_2] : memref<1x64xf32, #tpu.memory_space<vmem>>, vector<1x64xf32>
    %c0_3 = arith.constant 0 : index
    %c0_4 = arith.constant 0 : index
    %3 = vector.load %arg4[%c0_3, %c0_4] : memref<32x64xf32, #tpu.memory_space<vmem>>, vector<32x64xf32>
    %cst = arith.constant dense<0.000000e+00> : vector<16x64xf32>
    %4 = tpu.matmul %0, %3, %cst {dimension_numbers = #tpu.dot_dimension_numbers<[1], [0], [0], [1], [0, 0, 1, 1], [], []>} : vector<16x32xf32>, vector<32x64xf32>, vector<16x64xf32> -> vector<16x64xf32>
    %5 = vector.broadcast %2 : vector<1x64xf32> to vector<16x64xf32>
    %6 = arith.addf %5, %4 : vector<16x64xf32>
    %cst_5 = arith.constant dense<0x7F800000> : vector<16xf32>
    %7 = vector.multi_reduction <minimumf>, %6, %cst_5 [1] : vector<16x64xf32> to vector<16xf32>
    %8 = vector.shape_cast %7 : vector<16xf32> to vector<16x1xf32>
    %9 = vector.broadcast %8 : vector<16x1xf32> to vector<16x64xf32>
    %10 = arith.cmpf oeq, %6, %9 : vector<16x64xf32>
    %c64_i32 = arith.constant 64 : i32
    %11 = vector.broadcast %c64_i32 : i32 to vector<16x64xi32>
    %12 = arith.select %10, %1, %11 : vector<16x64xi1>, vector<16x64xi32>
    %cst_6 = arith.constant dense<2147483647> : vector<16xi32>
    %13 = vector.multi_reduction <minsi>, %12, %cst_6 [1] : vector<16x64xi32> to vector<16xi32>
    %14 = vector.shape_cast %13 : vector<16xi32> to vector<16x1xi32>
    %15 = vector.broadcast %14 : vector<16x1xi32> to vector<16x64xi32>
    %16 = arith.cmpi eq, %1, %15 : vector<16x64xi32>
    %17 = arith.extui %16 : vector<16x64xi1> to vector<16x64xi32>
    %18 = arith.sitofp %17 : vector<16x64xi32> to vector<16x64xf32>
    %c0_7 = arith.constant 0 : index
    %c0_8 = arith.constant 0 : index
    %19 = vector.load %arg2[%c0_7, %c0_8] : memref<64x32xf32, #tpu.memory_space<vmem>>, vector<64x32xf32>
    %cst_9 = arith.constant dense<0.000000e+00> : vector<16x32xf32>
    %20 = tpu.matmul %18, %19, %cst_9 {dimension_numbers = #tpu.dot_dimension_numbers<[1], [0], [0], [1], [0, 0, 1, 1], [], []>} : vector<16x64xf32>, vector<64x32xf32>, vector<16x32xf32> -> vector<16x32xf32>
    %21 = arith.subf %0, %20 : vector<16x32xf32>
    %c0_10 = arith.constant 0 : index
    %c0_11 = arith.constant 0 : index
    %22 = vector.load %arg7[%c0_10, %c0_11] : memref<1x64xf32, #tpu.memory_space<vmem>>, vector<1x64xf32>
    %c0_12 = arith.constant 0 : index
    %c0_13 = arith.constant 0 : index
    %23 = vector.load %arg5[%c0_12, %c0_13] : memref<32x64xf32, #tpu.memory_space<vmem>>, vector<32x64xf32>
    %cst_14 = arith.constant dense<0.000000e+00> : vector<16x64xf32>
    %24 = tpu.matmul %21, %23, %cst_14 {dimension_numbers = #tpu.dot_dimension_numbers<[1], [0], [0], [1], [0, 0, 1, 1], [], []>} : vector<16x32xf32>, vector<32x64xf32>, vector<16x64xf32> -> vector<16x64xf32>
    %25 = vector.broadcast %22 : vector<1x64xf32> to vector<16x64xf32>
    %26 = arith.addf %25, %24 : vector<16x64xf32>
    %cst_15 = arith.constant dense<0x7F800000> : vector<16xf32>
    %27 = vector.multi_reduction <minimumf>, %26, %cst_15 [1] : vector<16x64xf32> to vector<16xf32>
    %28 = vector.shape_cast %27 : vector<16xf32> to vector<16x1xf32>
    %29 = vector.broadcast %28 : vector<16x1xf32> to vector<16x64xf32>
    %30 = arith.cmpf oeq, %26, %29 : vector<16x64xf32>
    %c64_i32_16 = arith.constant 64 : i32
    %31 = vector.broadcast %c64_i32_16 : i32 to vector<16x64xi32>
    %32 = arith.select %30, %1, %31 : vector<16x64xi1>, vector<16x64xi32>
    %cst_17 = arith.constant dense<2147483647> : vector<16xi32>
    %33 = vector.multi_reduction <minsi>, %32, %cst_17 [1] : vector<16x64xi32> to vector<16xi32>
    %34 = vector.shape_cast %33 : vector<16xi32> to vector<16x1xi32>
    %35 = vector.broadcast %34 : vector<16x1xi32> to vector<16x64xi32>
    %36 = arith.cmpi eq, %1, %35 : vector<16x64xi32>
    %37 = arith.extui %36 : vector<16x64xi1> to vector<16x64xi32>
    %38 = arith.sitofp %37 : vector<16x64xi32> to vector<16x64xf32>
    %c0_18 = arith.constant 0 : index
    %c0_19 = arith.constant 0 : index
    %39 = vector.load %arg3[%c0_18, %c0_19] : memref<64x32xf32, #tpu.memory_space<vmem>>, vector<64x32xf32>
    %cst_20 = arith.constant dense<0.000000e+00> : vector<16x32xf32>
    %40 = tpu.matmul %38, %39, %cst_20 {dimension_numbers = #tpu.dot_dimension_numbers<[1], [0], [0], [1], [0, 0, 1, 1], [], []>} : vector<16x64xf32>, vector<64x32xf32>, vector<16x32xf32> -> vector<16x32xf32>
    %c0_21 = arith.constant 0 : index
    %c0_22 = arith.constant 0 : index
    %41 = vector.load %arg8[%c0_21, %c0_22] : memref<16x32xf32, #tpu.memory_space<vmem>>, vector<16x32xf32>
    tpu.vector_store %arg8[%c0_21, %c0_22], %20 {strides = array<i32>} : memref<16x32xf32, #tpu.memory_space<vmem>>, vector<16x32xf32>,
    %c0_23 = arith.constant 0 : index
    %c0_24 = arith.constant 0 : index
    %42 = vector.load %arg9[%c0_23, %c0_24] : memref<16x32xf32, #tpu.memory_space<vmem>>, vector<16x32xf32>
    tpu.vector_store %arg9[%c0_23, %c0_24], %40 {strides = array<i32>} : memref<16x32xf32, #tpu.memory_space<vmem>>, vector<16x32xf32>,
    %43 = arith.addf %20, %40 : vector<16x32xf32>
    %c0_25 = arith.constant 0 : index
    %c0_26 = arith.constant 0 : index
    %44 = vector.load %arg10[%c0_25, %c0_26] : memref<16x32xf32, #tpu.memory_space<vmem>>, vector<16x32xf32>
    tpu.vector_store %arg10[%c0_25, %c0_26], %43 {strides = array<i32>} : memref<16x32xf32, #tpu.memory_space<vmem>>, vector<16x32xf32>,
    %cst_27 = arith.constant 1.000000e+00 : f32
    %45 = vector.broadcast %cst_27 : f32 to vector<1x16xf32>
    %cst_28 = arith.constant dense<0.000000e+00> : vector<1x64xf32>
    %46 = tpu.matmul %45, %18, %cst_28 {dimension_numbers = #tpu.dot_dimension_numbers<[1], [0], [0], [1], [0, 0, 1, 1], [], []>} : vector<1x16xf32>, vector<16x64xf32>, vector<1x64xf32> -> vector<1x64xf32>
    %cst_29 = arith.constant dense<0.000000e+00> : vector<1x64xf32>
    %47 = tpu.matmul %45, %38, %cst_29 {dimension_numbers = #tpu.dot_dimension_numbers<[1], [0], [0], [1], [0, 0, 1, 1], [], []>} : vector<1x16xf32>, vector<16x64xf32>, vector<1x64xf32> -> vector<1x64xf32>
    %48 = tpu.concatenate %46, %47 in 0 : vector<1x64xf32>, vector<1x64xf32> -> vector<2x64xf32>
    %c0_30 = arith.constant 0 : index
    %c0_31 = arith.constant 0 : index
    %c0_32 = arith.constant 0 : index
    %49 = vector.load %arg11[%c0_30, %c0_31, %c0_32] : memref<1x2x64xf32, #tpu.memory_space<vmem>>, vector<1x2x64xf32>
    %50 = vector.shape_cast %49 : vector<1x2x64xf32> to vector<2x64xf32>
    %51 = vector.shape_cast %48 : vector<2x64xf32> to vector<1x2x64xf32>
    tpu.vector_store %arg11[%c0_30, %c0_31, %c0_32], %51 {strides = array<i32>} : memref<1x2x64xf32, #tpu.memory_space<vmem>>, vector<1x2x64xf32>,
    return
  }
  func.func @transform_0(%arg0: i32) -> (i32, i32) {
    %c0_i32 = arith.constant 0 : i32
    %c0_i32_0 = arith.constant 0 : i32
    return %arg0, %c0_i32 : i32, i32
  }
  func.func @transform_1(%arg0: i32) -> (i32, i32) {
    %c0_i32 = arith.constant 0 : i32
    %c0_i32_0 = arith.constant 0 : i32
    %c0_i32_1 = arith.constant 0 : i32
    return %c0_i32, %c0_i32_0 : i32, i32
  }
  func.func @transform_2(%arg0: i32) -> (i32, i32) {
    %c0_i32 = arith.constant 0 : i32
    %c0_i32_0 = arith.constant 0 : i32
    %c0_i32_1 = arith.constant 0 : i32
    return %c0_i32, %c0_i32_0 : i32, i32
  }
  func.func @transform_3(%arg0: i32) -> (i32, i32) {
    %c0_i32 = arith.constant 0 : i32
    %c0_i32_0 = arith.constant 0 : i32
    %c0_i32_1 = arith.constant 0 : i32
    return %c0_i32, %c0_i32_0 : i32, i32
  }
  func.func @transform_4(%arg0: i32) -> (i32, i32) {
    %c0_i32 = arith.constant 0 : i32
    %c0_i32_0 = arith.constant 0 : i32
    %c0_i32_1 = arith.constant 0 : i32
    return %c0_i32, %c0_i32_0 : i32, i32
  }
  func.func @transform_5(%arg0: i32) -> (i32, i32) {
    %c0_i32 = arith.constant 0 : i32
    %c0_i32_0 = arith.constant 0 : i32
    %c0_i32_1 = arith.constant 0 : i32
    return %c0_i32, %c0_i32_0 : i32, i32
  }
  func.func @transform_6(%arg0: i32) -> (i32, i32) {
    %c0_i32 = arith.constant 0 : i32
    %c0_i32_0 = arith.constant 0 : i32
    %c0_i32_1 = arith.constant 0 : i32
    return %c0_i32, %c0_i32_0 : i32, i32
  }
  func.func @transform_7(%arg0: i32) -> (i32, i32) {
    %c0_i32 = arith.constant 0 : i32
    %c0_i32_0 = arith.constant 0 : i32
    return %arg0, %c0_i32 : i32, i32
  }
  func.func @transform_8(%arg0: i32) -> (i32, i32) {
    %c0_i32 = arith.constant 0 : i32
    %c0_i32_0 = arith.constant 0 : i32
    return %arg0, %c0_i32 : i32, i32
  }
  func.func @transform_9(%arg0: i32) -> (i32, i32) {
    %c0_i32 = arith.constant 0 : i32
    %c0_i32_0 = arith.constant 0 : i32
    return %arg0, %c0_i32 : i32, i32
  }
  func.func @transform_10(%arg0: i32) -> (i32, i32, i32) {
    %c0_i32 = arith.constant 0 : i32
    %c0_i32_0 = arith.constant 0 : i32
    %c0_i32_1 = arith.constant 0 : i32
    return %arg0, %c0_i32, %c0_i32_0 : i32, i32, i32
  }
}

</mosaic_0001>

<bundles_post_ra>
// kernel: tpu_custom_call.1
= control target key start
LH: loop header
LB: loop body
LE: loop exit
PB: predicated region body
PF: predicated region fallthrough
CT: control target
= control target key end

     0   :  { %16 = vsyncpa [#allocation3], 0  ;;  %s1296_s0 = inlined_call_operand.vmem [shape: f32[16,32], index: 0, kind: input, shape index: {}]   ;;  %s1297_s1 = inlined_call_operand.vmem [shape: f32[64,32], index: 1, kind: input, shape index: {}]   ;;  %s1298_s2 = inlined_call_operand.vmem [shape: f32[64,32], index: 2, kind: input, shape index: {}]   ;;  %s1299_s3 = inlined_call_operand.vmem [shape: f32[32,64], index: 3, kind: input, shape index: {}]   ;;  %s1300_s4 = inlined_call_operand.vmem [shape: f32[32,64], index: 4, kind: input, shape index: {}]   ;;  %s1301_s5 = inlined_call_operand.vmem [shape: f32[1,64], index: 5, kind: input, shape index: {}]   ;;  %s1302_s6 = inlined_call_operand.vmem [shape: f32[1,64], index: 6, kind: input, shape index: {}]   ;;  %s1303_s7 = inlined_call_operand.hbm [shape: f32[16,32], index: 7, kind: output, shape index: {0}]   ;;  %s1304_s8 = inlined_call_operand.hbm [shape: f32[16,32], index: 8, kind: output, shape index: {1}]   ;;  %s1305_s9 = inlined_call_operand.hbm [shape: f32[16,32], index: 9, kind: output, shape index: {2}]   ;;  %s1306_s10 = inlined_call_operand.hbm [shape: f32[1,2,64], index: 10, kind: output, shape index: {3}]  }
   0x1   :  { %17 = vsyncpa [#allocation5], 0  ;;  %v38_v0 = vld [vmem:[%s1299_s3] sm:$0xff]  ;;  %v39_v1 = vld [vmem:[%s1299_s3 + $0x8] sm:$0xff]  ;;  %vm42_vm0 = vcmask 261120  }
   0x2   :  { %v40_v2 = vld [vmem:[%s1299_s3 + $0x10] sm:$0xff]  ;;  %v851_v3 = vpack.c.bf16 %v39_v1, %v38_v0  ;;  %v41_v4 = vld [vmem:[%s1299_s3 + $0x18] sm:$0xff]  ;;  %v1091_v5 = vld [vmem:[%s1296_s0] sm:$0xff] }
   0x3   :  { %v855_v6 = vpack.c.bf16 %v41_v4, %v40_v2  ;;  %785 = vmatprep.mubr.msk.f32.mxu0 %vm42_vm0, %v1091_v5 }
   0x4   :  { %18 = vsyncpa [#allocation8], 0  ;;  %852 = vmatprep.subr.bf16.mxu0 %v851_v3  ;;  %v1098_v7 = vld [vmem:[%s1296_s0 + $0x8] sm:$0xff]  ;;  %v721_v8 = vld [vmem:[%s1301_s5] ss:$0 sm:$0xff]  ;;  %vm132_vm1 = vcmask 523264   ;;  %v35_v15 = vlaneseq }
   0x5   :  { %854 = vmatpush3.bf16.msra.mxu0 %v851_v3  ;;  %v179_v27 = vld [vmem:[%s1297_s1] sm:$0xff]  ;;  %v180_v28 = vld [vmem:[%s1297_s1 + $0x8] sm:$0xff]  ;;  %v181_v29 = vld [vmem:[%s1297_s1 + $0x10] sm:$0xff]  ;;  %v1010_v47 = vmov 0.0|0.0   ;;  %v1011_v60 = vmov 0.0   ;;  %vm1013_vm13 = vmmov 0  }
   0x6   :  { %856 = vmatprep.subr.bf16.mxu0 %v855_v6  ;;  %v1107_v16 = vand.u32 127, %v35_v15  ;;  %v859_v30 = vpack.c.bf16 %v180_v28, %v179_v27  ;;  %v182_v31 = vld [vmem:[%s1297_s1 + $0x18] sm:$0xff]  ;;  %v183_v41 = vld [vmem:[%s1297_s1 + $0x20] sm:$0xff]  ;;  %v184_v42 = vld [vmem:[%s1297_s1 + $0x28] sm:$0xff]  ;;  %v1012_v0 = vmov 1.0|1.0  }
   0x7   :  { %v863_v32 = vpack.c.bf16 %v182_v31, %v181_v29  ;;  %v867_v43 = vpack.c.bf16 %v184_v42, %v183_v41  ;;  %v185_v44 = vld [vmem:[%s1297_s1 + $0x30] sm:$0xff]  ;;  %v186_v45 = vld [vmem:[%s1297_s1 + $0x38] sm:$0xff]  ;;  %v271_v48 = vld [vmem:[%s1300_s4] sm:$0xff]  ;;  %vm507_vm14 = vcmask 130048  }
   0x8   :  { %860 = vmatprep.subr.bf16.mxu1 %v859_v30  ;;  %v871_v46 = vpack.c.bf16 %v186_v45, %v185_v44  ;;  %v272_v49 = vld [vmem:[%s1300_s4 + $0x8] sm:$0xff]  ;;  %v273_v1 = vld [vmem:[%s1300_s4 + $0x10] sm:$0xff]  ;;  %v274_v2 = vld [vmem:[%s1300_s4 + $0x18] sm:$0xff] }
   0x9   :  { %858 = vmatpush3.bf16.msra.mxu0 %v855_v6  ;;  %862 = vmatpush3.bf16.msra.mxu1 %v859_v30  ;;  %v875_v50 = vpack.c.bf16 %v272_v49, %v271_v48  ;;  %v879_v3 = vpack.c.bf16 %v274_v2, %v273_v1  ;;  %v411_v27 = vld [vmem:[%s1298_s2 + $0x8] sm:$0xff]  ;;  %v412_v28 = vld [vmem:[%s1298_s2 + $0x10] sm:$0xff]  ;;  %v413_v30 = vld [vmem:[%s1298_s2 + $0x18] sm:$0xff] }
   0xa   :  { %864 = vmatprep.subr.bf16.mxu1 %v863_v32  ;;  %v887_v31 = vpack.c.bf16 %v413_v30, %v412_v28  ;;  %v415_v41 = vld [vmem:[%s1298_s2 + $0x28] sm:$0xff]  ;;  %v417_v44 = vld [vmem:[%s1298_s2 + $0x38] sm:$0xff] }
   0xb   :  { %876 = vmatprep.subr.bf16.mxu0 %v875_v50 }
   0xc   :  { %786 = vmatmul.mubr.msk.f32.vlgmr.msra.gmra.mrb[0].mxu0 %vm42_vm0, %v1098_v7 }
   0xd   :  { %866 = vmatpush3.bf16.msra.mxu1 %v863_v32  ;;  %878 = vmatpush3.bf16.msra.mxu0 %v875_v50 }
   0xe   :  { %868 = vmatprep.subr.bf16.mxu1 %v867_v43  ;;  %880 = vmatprep.subr.bf16.mxu0 %v879_v3 }
  0x11   :  { %870 = vmatpush3.bf16.msra.mxu1 %v867_v43  ;;  %882 = vmatpush3.bf16.msra.mxu0 %v879_v3  ;;  %v416_v43 = vld [vmem:[%s1298_s2 + $0x30] sm:$0xff] }
  0x12   :  { %872 = vmatprep.subr.bf16.mxu1 %v871_v46  ;;  %v895_v45 = vpack.c.bf16 %v417_v44, %v416_v43 }
  0x15   :  { %874 = vmatpush3.bf16.msra.mxu1 %v871_v46  ;;  %v1014_v46 = vmov 1.0  }
  0x16   :  { %899 = vmatprep.subr.bf16.mxu1 %v1010_v47 }
  0xdf   :  { %v787_v9 = vpop.f32.mrb[0].mxu0 }
  0xe0   :  { %v115_v10 = vpop.f32.mrb[1].mxu0  ;;  %v131_v12 = vadd.f32 %v787_v9, %v721_v8 }
  0xe1   :  { %v130_v11 = vadd.f32 %v721_v8, %v115_v10  ;;  %v728_v10 = vld [vmem:[%s1302_s6] ss:$0 sm:$0xff] }
  0xe2   :  { %v136_v14 = vsel %vm132_vm1, %v131_v12, inf }
  0xe3   :  { %v133_v13 = vsel %vm132_vm1, %v130_v11, inf }
  0xe4   :  { %134 = vmin.xlane.f32.xlu0 %v133_v13 }
  0xe8   :  { %137 = vmin.xlane.f32.xlu0 %v136_v14 }
 0x171   :  { %v135_v17 = vpop.xlane.xlu0 %134 }
 0x172   :  { %vm139_vm2 = vcmp.eq.f32.partialorder %v130_v11, %v135_v17 }
 0x173   :  { %v141_v18 = vsel %vm139_vm2, %v1107_v16, 64 }
 0x174   :  { %v143_v19 = vsel %vm132_vm1, %v141_v18, 2147483647 }
 0x175   :  { %v138_v20 = vpop.xlane.xlu0 %137  ;;  %v145_v21 = vshra.s32 %v143_v19, 16  ;;  %v144_v33 = vand.u32 65535, %v143_v19 }
 0x176   :  { %vm140_vm3 = vcmp.eq.f32.partialorder %v131_v12, %v138_v20 }
 0x177   :  { %v142_v22 = vsel %vm140_vm3, %v1107_v16, 64  ;;  %v147_v23 = vcvt.s32.f32 %v145_v21  ;;  %v146_v35 = vcvt.s32.f32 %v144_v33 }
 0x178   :  { %v158_v24 = vsel %vm132_vm1, %v142_v22, 2147483647 }
 0x179   :  { %148 = vmin.xlane.f32.xlu1 %v147_v23  ;;  %v160_v25 = vshra.s32 %v158_v24, 16  ;;  %v159_v36 = vand.u32 65535, %v158_v24 }
 0x17b   :  { %v162_v26 = vcvt.s32.f32 %v160_v25  ;;  %v161_v39 = vcvt.s32.f32 %v159_v36 }
 0x17d   :  { %163 = vmin.xlane.f32.xlu1 %v162_v26 }
 0x206   :  { %v149_v34 = vpop.xlane.xlu1 %148 }
 0x207   :  { %vm150_vm4 = vcmp.eq.f32.partialorder %v147_v23, %v149_v34  ;;  %v155_v51 = vcvt.f32.s32 %v149_v34 }
 0x208   :  { %v151_v37 = vsel %vm150_vm4, %v146_v35, inf }
 0x209   :  { %152 = vmin.xlane.f32.xlu0 %v151_v37  ;;  %v156_v53 = vshll.u32 %v155_v51, 16 }
 0x20a   :  { %v164_v38 = vpop.xlane.xlu1 %163 }
 0x20b   :  { %vm165_vm5 = vcmp.eq.f32.partialorder %v162_v26, %v164_v38  ;;  %v170_v54 = vcvt.f32.s32 %v164_v38  ;;  %v410_v26 = vld [vmem:[%s1298_s2] sm:$0xff] }
 0x20c   :  { %v166_v40 = vsel %vm165_vm5, %v161_v39, inf  ;;  %v883_v29 = vpack.c.bf16 %v411_v27, %v410_v26 }
 0x20d   :  { %167 = vmin.xlane.f32.xlu1 %v166_v40  ;;  %v171_v58 = vshll.u32 %v170_v54, 16  ;;  %v414_v40 = vld [vmem:[%s1298_s2 + $0x20] sm:$0xff]  ;;  %s1015_s2 = smov [#allocation2]  }
 0x20e   :  { %884 = vmatprep.subr.bf16.mxu0 %v883_v29  ;;  %v891_v42 = vpack.c.bf16 %v415_v41, %v414_v40  ;;  %s663_s20 = sshll.u32 %s1015_s2, 4  ;;  %s664_s20 = int_to_ptr.vmem [resolvable:$true] %s663_s20 }
 0x20f   :  { %s916_s21 = scalar_lea.vmem %s664_s20, 256  ;;  %p921_p1 = scmp.lt.s32.totalorder %s664_s20, %s664_s20 }
 0x210   :  { %p917_p0 = scmp.ne.s32.totalorder %s664_s20, %s916_s21  ;;  %p922_p2 = scmp.lt.s32.totalorder %s916_s21, %s916_s21 }
 0x212   :  { %p923_p3 = por %p922_p2, %p921_p1 }
 0x214   :  { %p924_p4 = pnand %p923_p3, %p917_p0 }
 0x296   :  { %v153_v52 = vpop.xlane.xlu0 %152 }
 0x297   :  { %v154_v55 = vcvt.f32.s32 %v153_v52 }
 0x299   :  { %v157_v56 = vadd.s32 %v156_v53, %v154_v55 }
 0x29a   :  { %v168_v57 = vpop.xlane.xlu1 %167 }
 0x29b   :  { %v169_v59 = vcvt.f32.s32 %v168_v57  ;;  %vm173_vm6 = vcmp.eq.s32.totalorder %v1107_v16, %v157_v56 }
 0x29c   :  { %v722_v61 = vsel %vm173_vm6, 1.0, %v1011_v60 }
 0x29d   :  { %v172_v62 = vadd.s32 %v171_v58, %v169_v59  ;;  %804 = vmatprep.mubr.msk.f32.mxu1 %vm132_vm1, %v722_v61 }
 0x29f   :  { %vm174_vm7 = vcmp.eq.s32.totalorder %v1107_v16, %v172_v62 }
 0x2a0   :  { %vm900_vm8 = vmpackc.low %vm174_vm7, %vm173_vm6  ;;  %v723_v63 = vsel %vm174_vm7, 1.0, %v1011_v60 }
 0x2a1   :  { %805 = vmatmul.mubr.msk.f32.vlgmr.msra.gmra.mrb[0].mxu1 %vm132_vm1, %v723_v63 }
 0x2a2   :  { %901 = vmatpush3.bf16.msk.msra.mxu1 %vm900_vm8, %v1012_v0  ;;  %841 = vmatprep.mubr.msk.f32.mxu1 %vm1013_vm13, %v1011_v60 }
 0x2a3   :  { %902 = vmatprep.subr.bf16.mxu1 %v1010_v47 }
 0x2a5   :  { %842 = vmatmul.mubr.msk.f32.vlgmr.msra.gmra.mrb[2].mxu1 %vm507_vm14, %v1014_v46 }
 0x2a6   :  { %848 = vmatprep.mubr.msk.f32.mxu1 %vm1013_vm13, %v1011_v60 }
 0x374   :  { %v1156_v4 = vpop.f32.mrb[0].mxu1 }
 0x375   :  { %500 = vst.msk [vmem:[#allocation2 + $0x8] sm:$0xff] %vm42_vm0, %v1156_v4  ;;  %v1160_v6 = vpop.f32.mrb[1].mxu1  ;;  %v269_v9 = vsub.f32 %v1098_v7, %v1156_v4 }
 0x376   :  { %v268_v8 = vsub.f32 %v1091_v5, %v1160_v6  ;;  %499 = vst.msk [vmem:[#allocation2] sm:$0xff] %vm42_vm0, %v1160_v6 }
 0x378   :  { %815 = vmatprep.mubr.msk.f32.mxu0 %vm42_vm0, %v268_v8  ;;  %v1214_v59 = vpop.f32.mrb[2].mxu1 }
 0x379   :  { %816 = vmatmul.mubr.msk.f32.vlgmr.msra.gmra.mrb[2].mxu0 %vm42_vm0, %v269_v9  ;;  %v843_v61 = vpop.f32.mrb[3].mxu1 }
 0x37a   :  { %886 = vmatpush3.bf16.msra.mxu0 %v883_v29 }
 0x37b   :  { %888 = vmatprep.subr.bf16.mxu0 %v887_v31 }
 0x37e   :  { %890 = vmatpush3.bf16.msra.mxu0 %v887_v31 }
 0x37f   :  { %892 = vmatprep.subr.bf16.mxu0 %v891_v42 }
 0x382   :  { %894 = vmatpush3.bf16.msra.mxu0 %v891_v42 }
 0x383   :  { %896 = vmatprep.subr.bf16.mxu0 %v895_v45 }
 0x386   :  { %898 = vmatpush3.bf16.msra.mxu0 %v895_v45 }
 0x44c   :  { %v817_v11 = vpop.f32.mrb[2].mxu0 }
 0x44d   :  { %v363_v12 = vadd.f32 %v817_v11, %v728_v10  ;;  %v347_v13 = vpop.f32.mrb[3].mxu0 }
 0x44e   :  { %v362_v14 = vadd.f32 %v728_v10, %v347_v13 }
 0x44f   :  { %v367_v5 = vsel %vm132_vm1, %v363_v12, inf }
 0x450   :  { %368 = vmin.xlane.f32.xlu1 %v367_v5  ;;  %v364_v15 = vsel %vm132_vm1, %v362_v14, inf }
 0x451   :  { %365 = vmin.xlane.f32.xlu0 %v364_v15 }
 0x4dd   :  { %v369_v17 = vpop.xlane.xlu1 %368 }
 0x4de   :  { %vm371_vm9 = vcmp.eq.f32.partialorder %v363_v12, %v369_v17  ;;  %v366_v7 = vpop.xlane.xlu0 %365 }
 0x4df   :  { %v373_v18 = vsel %vm371_vm9, %v1107_v16, 64  ;;  %vm370_vm10 = vcmp.eq.f32.partialorder %v362_v14, %v366_v7 }
 0x4e0   :  { %v389_v19 = vsel %vm132_vm1, %v373_v18, 2147483647  ;;  %v372_v20 = vsel %vm370_vm10, %v1107_v16, 64 }
 0x4e1   :  { %v374_v21 = vsel %vm132_vm1, %v372_v20, 2147483647  ;;  %v391_v22 = vshra.s32 %v389_v19, 16  ;;  %v390_v32 = vand.u32 65535, %v389_v19 }
 0x4e2   :  { %v376_v23 = vshra.s32 %v374_v21, 16  ;;  %v375_v33 = vand.u32 65535, %v374_v21 }
 0x4e3   :  { %v393_v24 = vcvt.s32.f32 %v391_v22  ;;  %v392_v35 = vcvt.s32.f32 %v390_v32 }
 0x4e4   :  { %v378_v25 = vcvt.s32.f32 %v376_v23  ;;  %v377_v37 = vcvt.s32.f32 %v375_v33 }
 0x4e5   :  { %394 = vmin.xlane.f32.xlu1 %v393_v24 }
 0x4e6   :  { %379 = vmin.xlane.f32.xlu0 %v378_v25 }
 0x572   :  { %v395_v34 = vpop.xlane.xlu1 %394 }
 0x573   :  { %v380_v36 = vpop.xlane.xlu0 %379  ;;  %vm396_vm11 = vcmp.eq.f32.partialorder %v393_v24, %v395_v34  ;;  %v401_v47 = vcvt.f32.s32 %v395_v34 }
 0x574   :  { %v397_v38 = vsel %vm396_vm11, %v392_v35, inf  ;;  %vm381_vm12 = vcmp.eq.f32.partialorder %v378_v25, %v380_v36  ;;  %v386_v48 = vcvt.f32.s32 %v380_v36 }
 0x575   :  { %398 = vmin.xlane.f32.xlu1 %v397_v38  ;;  %v382_v39 = vsel %vm381_vm12, %v377_v37, inf  ;;  %v402_v50 = vshll.u32 %v401_v47, 16 }
 0x576   :  { %383 = vmin.xlane.f32.xlu0 %v382_v39  ;;  %v387_v53 = vshll.u32 %v386_v48, 16 }
 0x602   :  { %v399_v49 = vpop.xlane.xlu1 %398 }
 0x603   :  { %v400_v51 = vcvt.f32.s32 %v399_v49  ;;  %v384_v52 = vpop.xlane.xlu0 %383 }
 0x604   :  { %v385_v54 = vcvt.f32.s32 %v384_v52 }
 0x605   :  { %v403_v55 = vadd.s32 %v402_v50, %v400_v51 }
 0x606   :  { %v388_v56 = vadd.s32 %v387_v53, %v385_v54 }
 0x607   :  { %vm405_vm15 = vcmp.eq.s32.totalorder %v1107_v16, %v403_v55 }
 0x608   :  { %vm404_vm2 = vcmp.eq.s32.totalorder %v1107_v16, %v388_v56  ;;  %v730_v58 = vsel %vm405_vm15, 1.0, %v1011_v60 }
 0x609   :  { %vm903_vm3 = vmpackc.low %vm405_vm15, %vm404_vm2  ;;  %v729_v57 = vsel %vm404_vm2, 1.0, %v1011_v60 }
 0x60a   :  { %834 = vmatprep.mubr.msk.f32.mxu0 %vm132_vm1, %v729_v57  ;;  %904 = vmatpush3.bf16.msk.msra.mxu1 %vm903_vm3, %v1012_v0 }
 0x60b   :  { %835 = vmatmul.mubr.msk.f32.vlgmr.msra.gmra.mrb[4].mxu0 %vm132_vm1, %v730_v58 }
 0x60d   :  { %849 = vmatmul.mubr.msk.f32.vlgmr.msra.gmra.mrb[4].mxu1 %vm507_vm14, %v1014_v46 }
 0x60e   :  { %927 = shalt.err (!%p924_p4)
}
 0x60f   :  { %s928_s1 = scalar_lea.hbm %s1303_s7, 256 }
 0x610   :  { %p929_p5 = scmp.ne.s32.totalorder %s1303_s7, %s928_s1  ;;  %p932_p6 = scmp.lt.u32.totalorder %s928_s1, %s1303_s7 }
 0x612   :  { %p934_p7 = pnand %p932_p6, %p929_p5 }
 0x614   :  { %937 = shalt.err (!%p934_p7)
}
 0x615   :  { %s1016_s0 = smov 128   ;;  %s1017_s6 = smov 8   ;;  %vm654_vm1 = vcmask 1040384  }
 0x616   :  { %669 = dma.vmem_to_hbm [thread:$0]  %s664_s20, 256, %s1303_s7, [#allocation3], %s1016_s0, %s1016_s0, %s1017_s6  }
 0x617   :  { %s1018_s27 = smov [#allocation4]   ;;  %s1019_s29 = smov [#allocation6]  }
 0x618   :  { %s675_s28 = sshll.u32 %s1018_s27, 4  ;;  %s687_s30 = sshll.u32 %s1019_s29, 4  ;;  %s1231_s28 = int_to_ptr.vmem [resolvable:$true] %s675_s28  ;;  %s1237_s30 = int_to_ptr.vmem [resolvable:$true] %s687_s30 }
 0x619   :  { %s1020_s11 = smov [#allocation7]   ;;  %s938_s7 = scalar_lea.vmem %s1231_s28, 256 }
 0x61a   :  { %s700_s12 = sshll.u32 %s1020_s11, 4  ;;  %p939_p8 = scmp.ne.s32.totalorder %s1231_s28, %s938_s7  ;;  %s701_s12 = int_to_ptr.vmem [resolvable:$true] %s700_s12 }
 0x61b   :  { %p943_p9 = scmp.lt.s32.totalorder %s1231_s28, %s1231_s28  ;;  %p944_p10 = scmp.lt.s32.totalorder %s938_s7, %s938_s7 }
 0x61d   :  { %p945_p11 = por %p944_p10, %p943_p9 }
 0x61f   :  { %p946_p12 = pnand %p945_p11, %p939_p8 }
 0x6de   :  { %v836_v16 = vpop.f32.mrb[4].mxu0 }
 0x6df   :  { %502 = vst.msk [vmem:[#allocation4 + $0x8] sm:$0xff] %vm42_vm0, %v836_v16  ;;  %v504_v60 = vadd.f32 %v836_v16, %v1156_v4  ;;  %v490_v62 = vpop.f32.mrb[5].mxu0 }
 0x6e0   :  { %501 = vst.msk [vmem:[#allocation4] sm:$0xff] %vm42_vm0, %v490_v62  ;;  %v503_v63 = vadd.f32 %v490_v62, %v1160_v6  ;;  %v647_v0 = vpop.f32.mrb[4].mxu1 }
 0x6e1   :  { %506 = vst.msk [vmem:[#allocation6 + $0x8] sm:$0xff] %vm42_vm0, %v504_v60  ;;  %v652_v1 = vrot.slane %v647_v0, 7  ;;  %v850_v2 = vpop.f32.mrb[5].mxu1 }
 0x6e2   :  { %949 = shalt.err (!%p946_p12)
}
 0x6e3   :  { %s950_s15 = scalar_lea.hbm %s1304_s8, 256 }
 0x6e4   :  { %p951_p13 = scmp.ne.s32.totalorder %s1304_s8, %s950_s15  ;;  %p954_p0 = scmp.lt.u32.totalorder %s950_s15, %s1304_s8 }
 0x6e6   :  { %p956_p1 = pnand %p954_p0, %p951_p13 }
 0x6e8   :  { %959 = shalt.err (!%p956_p1)
}
 0x6e9   :  { %681 = dma.vmem_to_hbm [thread:$0]  %s1231_s28, 256, %s1304_s8, [#allocation5], %s1016_s0, %s1016_s0, %s1017_s6   ;;  %vm656_vm4 = vcmask 517120   ;;  %505 = vst.msk [vmem:[#allocation6] sm:$0xff] %vm42_vm0, %v503_v63 }
 0x6ea   :  { %s960_s21 = scalar_lea.vmem %s1237_s30, 256  ;;  %p965_p3 = scmp.lt.s32.totalorder %s1237_s30, %s1237_s30 }
 0x6eb   :  { %p961_p2 = scmp.ne.s32.totalorder %s1237_s30, %s960_s21  ;;  %p966_p4 = scmp.lt.s32.totalorder %s960_s21, %s960_s21 }
 0x6ed   :  { %p967_p5 = por %p966_p4, %p965_p3 }
 0x6ef   :  { %p968_p6 = pnand %p967_p5, %p961_p2 }
 0x6f1   :  { %971 = shalt.err (!%p968_p6)
}
 0x6f2   :  { %s972_s1 = scalar_lea.hbm %s1305_s9, 256 }
 0x6f3   :  { %p973_p7 = scmp.ne.s32.totalorder %s1305_s9, %s972_s1  ;;  %p976_p8 = scmp.lt.u32.totalorder %s972_s1, %s1305_s9 }
 0x6f5   :  { %p978_p9 = pnand %p976_p8, %p973_p7 }
 0x6f7   :  { %981 = shalt.err (!%p978_p9)
}
 0x6f8   :  { %693 = dma.vmem_to_hbm [thread:$0]  %s1237_s30, 256, %s1305_s9, [#allocation5], %s1016_s0, %s1016_s0, %s1017_s6   ;;  %v655_v3 = vsel %vm654_vm1, %v1214_v59, %v652_v1 }
 0x6f9   :  { %657 = vst.msk [vmem:[#allocation7] sm:$0x3] %vm656_vm4, %v655_v3  ;;  %s982_s26 = scalar_lea.vmem %s701_s12, 32  ;;  %p987_p11 = scmp.lt.s32.totalorder %s701_s12, %s701_s12 }
 0x6fa   :  { %p983_p10 = scmp.ne.s32.totalorder %s701_s12, %s982_s26  ;;  %p988_p12 = scmp.lt.s32.totalorder %s982_s26, %s982_s26 }
 0x6fc   :  { %p989_p13 = por %p988_p12, %p987_p11 }
 0x6fe   :  { %p990_p0 = pnand %p989_p13, %p983_p10 }
 0x700   :  { %993 = shalt.err (!%p990_p0)
}
 0x701   :  { %s994_s29 = scalar_lea.hbm %s1306_s10, 32 }
 0x702   :  { %p995_p1 = scmp.ne.s32.totalorder %s1306_s10, %s994_s29  ;;  %p998_p2 = scmp.lt.u32.totalorder %s994_s29, %s1306_s10 }
 0x704   :  { %p1000_p3 = pnand %p998_p2, %p995_p1 }
 0x706   :  { %1003 = shalt.err (!%p1000_p3)
}
 0x707   :  { %703 = dma.vmem_to_hbm [thread:$0]  %s701_s12, 32, %s1306_s10, [#allocation8]  }
 0x708   :  { %1004 = dma.done.wait [#allocation3], 256  }
 0x709   :  { %1005 = vsyncadd [#allocation3], 4294967040 }
 0x70a   :  { %1006 = dma.done.wait [#allocation5], 512  }
 0x70b   :  { %1007 = vsyncadd [#allocation5], 4294966784 }
 0x70c   :  { %1008 = dma.done.wait [#allocation8], 32  }
 0x70d   :  { %1009 = vsyncadd [#allocation8], 4294967264 }
 0x70e   :  { %716 = vsyncpa [#allocation3], 1 }
 0x70f   :  { %717 = vsyncpa [#allocation5], 1 }
 0x710   :  { %718 = vsyncpa [#allocation8], 1 }

</bundles_post_ra>
